<compile_context>
chip_gen: v6e
topology: v6e:2x2x1
jax: 0.10.0
libtpu: 0.0.40
codegen_flags: <defaults>
</compile_context>

<pallas_src>
import functools

import jax
import jax.numpy as jnp
from jax.experimental import pallas as pl
from jax.experimental.pallas import tpu as pltpu

HIDDEN = 64
LANE = 128      # lane width: feature dims padded to a multiple of this
SUBLANE = 8     # sublane width: row offsets/tile heights aligned to this
TILE_B = 1024   # default batch tile (safe across v5e/v6e/v7x VMEM budgets)


def _round_up(x, m):
    return ((x + m - 1) // m) * m


# -----------------------------------------------------------------------------
# Kernel
# -----------------------------------------------------------------------------
def simple_policy_kernel(x_ref, p_ref, out_ref, *, d_in, d_h, d_out):
    """Fused forward: relu6(x@W1+b1) -> relu6(.@W2+b2) -> .@W3+b3.

    x_ref:   [TILE_B, d_in]  f32 activations (lane-padded obs)
    p_ref:   [d_in + 2*d_h + 3*SUBLANE, max(d_h, d_out)] packed params
             rows [0, d_in)              : W1 (padded)
             rows [d_in, d_in+d_h)       : W2 (padded)
             rows [d_in+d_h, d_in+2*d_h) : W3 (padded)
             rows r0, r0+8, r0+16        : b1, b2, b3 (each one row)
    out_ref: [TILE_B, d_out] f32 (lane-padded actions)
    """
    cdt = p_ref.dtype  # MXU operand dtype (float32 or bfloat16); f32 accumulation.

    # Static, tile-aligned slices into the single packed parameter buffer.
    w1 = p_ref[0:d_in, 0:d_h]
    w2 = p_ref[d_in:d_in + d_h, 0:d_h]
    w3 = p_ref[d_in + d_h:d_in + 2 * d_h, 0:d_out]
    r0 = d_in + 2 * d_h
    b1 = p_ref[r0:r0 + 1, 0:d_h].astype(jnp.float32)
    b2 = p_ref[r0 + SUBLANE:r0 + SUBLANE + 1, 0:d_h].astype(jnp.float32)
    b3 = p_ref[r0 + 2 * SUBLANE:r0 + 2 * SUBLANE + 1, 0:d_out].astype(jnp.float32)

    x = x_ref[...].astype(cdt)
    h1 = jnp.dot(x, w1, preferred_element_type=jnp.float32) + b1
    h1 = jnp.clip(h1, 0.0, 6.0)                      # ReLU6
    h2 = jnp.dot(h1.astype(cdt), w2, preferred_element_type=jnp.float32) + b2
    h2 = jnp.clip(h2, 0.0, 6.0)                      # ReLU6
    out_ref[...] = jnp.dot(h2.astype(cdt), w3, preferred_element_type=jnp.float32) + b3


# -----------------------------------------------------------------------------
# Parameter packing (one contiguous, lane-padded buffer)
# -----------------------------------------------------------------------------
def pack_params(w1, b1, w2, b2, w3, b3, dtype=jnp.float32):
    """Weights are [in, out] (transpose of nn.Linear's [out, in]); biases are [out]."""
    obs_dim, hidden = w1.shape
    action_dim = w3.shape[1]
    d_in = _round_up(obs_dim, LANE)
    d_h = _round_up(hidden, LANE)
    d_out = _round_up(action_dim, LANE)
    d_col = max(d_h, d_out)
    rows = d_in + 2 * d_h + 3 * SUBLANE
    r0 = d_in + 2 * d_h

    buf = jnp.zeros((rows, d_col), dtype)
    buf = buf.at[0:obs_dim, 0:hidden].set(w1.astype(dtype))
    buf = buf.at[d_in:d_in + hidden, 0:hidden].set(w2.astype(dtype))
    buf = buf.at[d_in + d_h:d_in + d_h + hidden, 0:action_dim].set(w3.astype(dtype))
    buf = buf.at[r0, 0:hidden].set(b1.reshape(-1).astype(dtype))
    buf = buf.at[r0 + SUBLANE, 0:hidden].set(b2.reshape(-1).astype(dtype))
    buf = buf.at[r0 + 2 * SUBLANE, 0:action_dim].set(b3.reshape(-1).astype(dtype))

    return {
        "packed": buf,
        "obs_dim": obs_dim,
        "action_dim": action_dim,
        "d_in": d_in,
        "d_h": d_h,
        "d_out": d_out,
    }


# -----------------------------------------------------------------------------
# Wrapper
# -----------------------------------------------------------------------------
def simple_policy_forward(obs, packed, *, tile_b=TILE_B):
    """obs: [B, obs_dim] f32. Returns [B, action_dim] f32."""
    B, obs_dim = obs.shape
    assert obs_dim == packed["obs_dim"]
    d_in, d_h, d_out = packed["d_in"], packed["d_h"], packed["d_out"]
    action_dim = packed["action_dim"]
    p = packed["packed"]

    # Batch tile: aligned to the sublane width, capped at tile_b; pad batch up.
    tb = min(tile_b, _round_up(B, SUBLANE))
    b_pad = _round_up(B, tb)
    x = jnp.pad(obs.astype(jnp.float32),
                ((0, b_pad - B), (0, d_in - obs_dim)))

    kernel = functools.partial(simple_policy_kernel, d_in=d_in, d_h=d_h, d_out=d_out)

    out_pad = pl.pallas_call(
        kernel,
        out_shape=jax.ShapeDtypeStruct((b_pad, d_out), jnp.float32),
        grid_spec=pltpu.PrefetchScalarGridSpec(
            num_scalar_prefetch=0,
            grid=(b_pad // tb,),
            in_specs=[
                pl.BlockSpec((tb, d_in), lambda i: (i, 0)),   # obs tiles stream
                pl.BlockSpec(p.shape, lambda i: (0, 0)),      # params VMEM-resident
            ],
            out_specs=pl.BlockSpec((tb, d_out), lambda i: (i, 0)),
        ),
        compiler_params=pltpu.CompilerParams(
            dimension_semantics=("parallel",)),
    )(x, p)

    return out_pad[:B, :action_dim]


# -----------------------------------------------------------------------------
# Init + pure-JAX reference
# -----------------------------------------------------------------------------
def init_raw_params(key, obs_dim, action_dim):
    """nn.Linear-style init; weights stored as [in, out] (transposed from PyTorch)."""
    ks = jax.random.split(key, 6)

    def linear(kw, kb, fan_in, fan_out):
        bound = 1.0 / jnp.sqrt(float(fan_in))
        w = jax.random.uniform(kw, (fan_in, fan_out), jnp.float32, -bound, bound)
        b = jax.random.uniform(kb, (fan_out,), jnp.float32, -bound, bound)
        return w, b

    w1, b1 = linear(ks[0], ks[1], obs_dim, HIDDEN)
    w2, b2 = linear(ks[2], ks[3], HIDDEN, HIDDEN)
    w3, b3 = linear(ks[4], ks[5], HIDDEN, action_dim)
    return w1, b1, w2, b2, w3, b3


def reference_forward(obs, w1, b1, w2, b2, w3, b3):
    h = jnp.clip(obs @ w1 + b1, 0.0, 6.0)
    h = jnp.clip(h @ w2 + b2, 0.0, 6.0)
    return h @ w3 + b3


# -----------------------------------------------------------------------------
# Main
# -----------------------------------------------------------------------------
if __name__ == "__main__":
    key = jax.random.PRNGKey(0)
    k_obs, k_params = jax.random.split(key)

    batch = 8
    obs_dim = 32
    action_dim = 8

    obs = jax.random.normal(k_obs, (batch, obs_dim), dtype=jnp.float32)
    raw = init_raw_params(k_params, obs_dim, action_dim)
    ref = reference_forward(obs, *raw)

    # Float32 parameters (exact semantics).
    packed_f32 = pack_params(*raw, dtype=jnp.float32)
    out_f32 = jax.block_until_ready(simple_policy_forward(obs, packed_f32))
    assert out_f32.shape == (batch, action_dim)
    assert jnp.allclose(out_f32, ref, atol=1e-4, rtol=1e-4), "f32 mismatch vs reference"

    # bfloat16 parameters/operands (f32 accumulation) — v5e/v6e/v7x MXU-native path.
    packed_bf16 = pack_params(*raw, dtype=jnp.bfloat16)
    out_bf16 = jax.block_until_ready(simple_policy_forward(obs, packed_bf16))
    assert out_bf16.shape == (batch, action_dim)
    assert jnp.allclose(out_bf16, ref, atol=5e-2, rtol=5e-2), "bf16 mismatch vs reference"

    print("KERNEL_OK")
</pallas_src>

<mosaic_0001>
module attributes {stable_mosaic.version = 11 : i64} {
  func.func @simple_policy_kernel(%arg0: i32, %arg1: memref<8x128xf32, #tpu.memory_space<vmem>>, %arg2: memref<408x128xf32, #tpu.memory_space<vmem>>, %arg3: memref<8x128xf32, #tpu.memory_space<vmem>>) attributes {dimension_semantics = [#tpu.dimension_semantics<parallel>], iteration_bounds = array<i64: 1>, scalar_prefetch = 0 : i64, scratch_operands = 0 : i64, tpu.core_type = #tpu.core_type<tc>, window_params = [{transform_indices = @transform_0, window_bounds = array<i64: 8, 128>}, {pipeline_mode = #tpu.pipeline_mode<synchronous>, transform_indices = @transform_1, window_bounds = array<i64: 408, 128>}, {transform_indices = @transform_2, window_bounds = array<i64: 8, 128>}]} {
    %c0 = arith.constant 0 : index
    %c0_0 = arith.constant 0 : index
    %0 = vector.load %arg2[%c0, %c0_0] : memref<408x128xf32, #tpu.memory_space<vmem>>, vector<128x128xf32>
    %c128 = arith.constant 128 : index
    %c0_1 = arith.constant 0 : index
    %1 = vector.load %arg2[%c128, %c0_1] : memref<408x128xf32, #tpu.memory_space<vmem>>, vector<128x128xf32>
    %c256 = arith.constant 256 : index
    %c0_2 = arith.constant 0 : index
    %2 = vector.load %arg2[%c256, %c0_2] : memref<408x128xf32, #tpu.memory_space<vmem>>, vector<128x128xf32>
    %c384 = arith.constant 384 : index
    %c0_3 = arith.constant 0 : index
    %3 = vector.load %arg2[%c384, %c0_3] : memref<408x128xf32, #tpu.memory_space<vmem>>, vector<1x128xf32>
    %c392 = arith.constant 392 : index
    %c0_4 = arith.constant 0 : index
    %4 = vector.load %arg2[%c392, %c0_4] : memref<408x128xf32, #tpu.memory_space<vmem>>, vector<1x128xf32>
    %c400 = arith.constant 400 : index
    %c0_5 = arith.constant 0 : index
    %5 = vector.load %arg2[%c400, %c0_5] : memref<408x128xf32, #tpu.memory_space<vmem>>, vector<1x128xf32>
    %c0_6 = arith.constant 0 : index
    %c0_7 = arith.constant 0 : index
    %6 = vector.load %arg1[%c0_6, %c0_7] : memref<8x128xf32, #tpu.memory_space<vmem>>, vector<8x128xf32>
    %cst = arith.constant dense<0.000000e+00> : vector<8x128xf32>
    %7 = tpu.matmul %6, %0, %cst {dimension_numbers = #tpu.dot_dimension_numbers<[1], [0], [0], [1], [0, 0, 1, 1], [], []>} : vector<8x128xf32>, vector<128x128xf32>, vector<8x128xf32> -> vector<8x128xf32>
    %8 = vector.broadcast %3 : vector<1x128xf32> to vector<8x128xf32>
    %9 = arith.addf %7, %8 : vector<8x128xf32>
    %cst_8 = arith.constant 0.000000e+00 : f32
    %cst_9 = arith.constant 6.000000e+00 : f32
    %10 = vector.broadcast %cst_8 : f32 to vector<8x128xf32>
    %11 = arith.maximumf %10, %9 : vector<8x128xf32>
    %12 = vector.broadcast %cst_9 : f32 to vector<8x128xf32>
    %13 = arith.minimumf %12, %11 : vector<8x128xf32>
    %cst_10 = arith.constant dense<0.000000e+00> : vector<8x128xf32>
    %14 = tpu.matmul %13, %1, %cst_10 {dimension_numbers = #tpu.dot_dimension_numbers<[1], [0], [0], [1], [0, 0, 1, 1], [], []>} : vector<8x128xf32>, vector<128x128xf32>, vector<8x128xf32> -> vector<8x128xf32>
    %15 = vector.broadcast %4 : vector<1x128xf32> to vector<8x128xf32>
    %16 = arith.addf %14, %15 : vector<8x128xf32>
    %cst_11 = arith.constant 0.000000e+00 : f32
    %cst_12 = arith.constant 6.000000e+00 : f32
    %17 = vector.broadcast %cst_11 : f32 to vector<8x128xf32>
    %18 = arith.maximumf %17, %16 : vector<8x128xf32>
    %19 = vector.broadcast %cst_12 : f32 to vector<8x128xf32>
    %20 = arith.minimumf %19, %18 : vector<8x128xf32>
    %cst_13 = arith.constant dense<0.000000e+00> : vector<8x128xf32>
    %21 = tpu.matmul %20, %2, %cst_13 {dimension_numbers = #tpu.dot_dimension_numbers<[1], [0], [0], [1], [0, 0, 1, 1], [], []>} : vector<8x128xf32>, vector<128x128xf32>, vector<8x128xf32> -> vector<8x128xf32>
    %22 = vector.broadcast %5 : vector<1x128xf32> to vector<8x128xf32>
    %23 = arith.addf %21, %22 : vector<8x128xf32>
    %c0_14 = arith.constant 0 : index
    %c0_15 = arith.constant 0 : index
    %24 = vector.load %arg3[%c0_14, %c0_15] : memref<8x128xf32, #tpu.memory_space<vmem>>, vector<8x128xf32>
    tpu.vector_store %arg3[%c0_14, %c0_15], %23 {strides = array<i32>} : memref<8x128xf32, #tpu.memory_space<vmem>>, vector<8x128xf32>,
    return
  }
  func.func @transform_0(%arg0: i32) -> (i32, i32) {
    %c0_i32 = arith.constant 0 : i32
    %c0_i32_0 = arith.constant 0 : i32
    return %arg0, %c0_i32 : i32, i32
  }
  func.func @transform_1(%arg0: i32) -> (i32, i32) {
    %c0_i32 = arith.constant 0 : i32
    %c0_i32_0 = arith.constant 0 : i32
    %c0_i32_1 = arith.constant 0 : i32
    return %c0_i32, %c0_i32_0 : i32, i32
  }
  func.func @transform_2(%arg0: i32) -> (i32, i32) {
    %c0_i32 = arith.constant 0 : i32
    %c0_i32_0 = arith.constant 0 : i32
    return %arg0, %c0_i32 : i32, i32
  }
}

</mosaic_0001>

<bundles_post_ra>
// kernel: tpu_custom_call.1
= control target key start
LH: loop header
LB: loop body
LE: loop exit
PB: predicated region body
PF: predicated region fallthrough
CT: control target
= control target key end

     0   :  { %7 = vsyncpa [#allocation3], 0  ;;  %s650_s0 = inlined_call_operand.hbm [shape: f32[8,128], index: 0, kind: input, shape index: {}]   ;;  %s651_s1 = inlined_call_operand.hbm [shape: f32[408,128], index: 1, kind: input, shape index: {}]   ;;  %s652_s2 = inlined_call_operand.hbm [shape: f32[8,128], index: 2, kind: output, shape index: {}]  }
   0x1   :  { %8 = vsyncpa [#allocation6], 0 }
   0x2   :  { %9 = vsyncpa [#allocation4], 0  ;;  %s565_s9 = smov [#allocation2]   ;;  %s566_s11 = smov [#allocation5]  }
   0x3   :  { %s16_s10 = sshll.u32 %s565_s9, 4  ;;  %s25_s12 = sshll.u32 %s566_s11, 4  ;;  %s17_s10 = int_to_ptr.vmem [resolvable:$true] %s16_s10  ;;  %s26_s12 = int_to_ptr.vmem [resolvable:$true] %s25_s12 }
   0x4   :  { %s507_s13 = scalar_lea.vmem %s17_s10, 128  ;;  %p512_p1 = scmp.lt.s32.totalorder %s17_s10, %s17_s10 }
   0x5   :  { %p508_p0 = scmp.ne.s32.totalorder %s17_s10, %s507_s13  ;;  %p513_p2 = scmp.lt.s32.totalorder %s507_s13, %s507_s13 }
   0x7   :  { %p514_p3 = por %p513_p2, %p512_p1 }
   0x9   :  { %p515_p4 = pnand %p514_p3, %p508_p0 }
   0xb   :  { %518 = shalt.err (!%p515_p4)
}
   0xc   :  { %19 = dma.hbm_to_vmem [thread:$0]  %s650_s0, 128, %s17_s10, [#allocation3]  }
   0xd   :  { %s527_s16 = scalar_lea.vmem %s26_s12, 6528  ;;  %p532_p6 = scmp.lt.s32.totalorder %s26_s12, %s26_s12 }
   0xe   :  { %p528_p5 = scmp.ne.s32.totalorder %s26_s12, %s527_s16  ;;  %p533_p7 = scmp.lt.s32.totalorder %s527_s16, %s527_s16 }
  0x10   :  { %p534_p8 = por %p533_p7, %p532_p6 }
  0x12   :  { %p535_p9 = pnand %p534_p8, %p528_p5 }
  0x14   :  { %538 = shalt.err (!%p535_p9)
}
  0x15   :  { %s567_s17 = smov 128   ;;  %s568_s18 = smov 8  }
  0x16   :  { %31 = dma.hbm_to_vmem [thread:$0]  %s651_s1, 6528, %s26_s12, [#allocation6], %s567_s17, %s567_s17, %s568_s18  }
  0x17   :  { %559 = dma.done.wait [#allocation3], 128  }
  0x18   :  { %560 = vsyncadd [#allocation3], 4294967168 }
  0x19   :  { %561 = dma.done.wait [#allocation6], 6528  }
  0x1a   :  { %562 = vsyncadd [#allocation6], 4294960768  ;;  %v569_v0 = vmov 0.0   ;;  %vm570_vm0 = vmmov 0   ;;  %v53_v1 = vld [vmem:[#allocation5 + $0x78] sm:$0xff]  ;;  %v52_v2 = vld [vmem:[#allocation5 + $0x70] sm:$0xff] }
  0x1b   :  { %387 = vmatprep.subr.mxu0 %v569_v0  ;;  %419 = vmatprep.mubr.msk.f32.mxu0 %vm570_vm0, %v569_v0  ;;  %v51_v3 = vld [vmem:[#allocation5 + $0x68] sm:$0xff]  ;;  %v50_v4 = vld [vmem:[#allocation5 + $0x60] sm:$0xff]  ;;  %v69_v5 = vld [vmem:[#allocation5 + $0xf8] sm:$0xff]  ;;  %s571_s0 = smov [#allocation7]  }
  0x1c   :  { %422 = vmatprep.subr.mxu1 %v569_v0  ;;  %454 = vmatprep.mubr.msk.f32.mxu1 %vm570_vm0, %v569_v0  ;;  %v49_v6 = vld [vmem:[#allocation5 + $0x58] sm:$0xff]  ;;  %v68_v7 = vld [vmem:[#allocation5 + $0xf0] sm:$0xff]  ;;  %v67_v8 = vld [vmem:[#allocation5 + $0xe8] sm:$0xff]  ;;  %s323_s1 = sshll.u32 %s571_s0, 4  ;;  %s324_s1 = int_to_ptr.vmem [resolvable:$true] %s323_s1 }
  0x1d   :  { %388 = vmatpush3.msra.mxu0 %v53_v1  ;;  %423 = vmatpush3.msra.mxu1 %v69_v5  ;;  %v48_v9 = vld [vmem:[#allocation5 + $0x50] sm:$0xff]  ;;  %v66_v10 = vld [vmem:[#allocation5 + $0xe0] sm:$0xff]  ;;  %v47_v11 = vld [vmem:[#allocation5 + $0x48] sm:$0xff]  ;;  %s539_s21 = scalar_lea.vmem %s324_s1, 128  ;;  %p544_p11 = scmp.lt.s32.totalorder %s324_s1, %s324_s1 }
  0x1e   :  { %389 = vmatprep.subr.mxu0 %v569_v0  ;;  %424 = vmatprep.subr.mxu1 %v569_v0  ;;  %v65_v12 = vld [vmem:[#allocation5 + $0xd8] sm:$0xff]  ;;  %v46_v13 = vld [vmem:[#allocation5 + $0x40] sm:$0xff]  ;;  %v64_v14 = vld [vmem:[#allocation5 + $0xd0] sm:$0xff]  ;;  %p540_p10 = scmp.ne.s32.totalorder %s324_s1, %s539_s21  ;;  %p545_p12 = scmp.lt.s32.totalorder %s539_s21, %s539_s21 }
  0x1f   :  { %390 = vmatpush3.msra.mxu0 %v52_v2  ;;  %425 = vmatpush3.msra.mxu1 %v68_v7  ;;  %v45_v15 = vld [vmem:[#allocation5 + $0x38] sm:$0xff]  ;;  %v63_v16 = vld [vmem:[#allocation5 + $0xc8] sm:$0xff]  ;;  %v44_v17 = vld [vmem:[#allocation5 + $0x30] sm:$0xff] }
  0x20   :  { %391 = vmatprep.subr.mxu0 %v569_v0  ;;  %426 = vmatprep.subr.mxu1 %v569_v0  ;;  %v62_v18 = vld [vmem:[#allocation5 + $0xc0] sm:$0xff]  ;;  %v43_v19 = vld [vmem:[#allocation5 + $0x28] sm:$0xff]  ;;  %v61_v20 = vld [vmem:[#allocation5 + $0xb8] sm:$0xff]  ;;  %p546_p13 = por %p545_p12, %p544_p11 }
  0x21   :  { %392 = vmatpush3.msra.mxu0 %v51_v3  ;;  %427 = vmatpush3.msra.mxu1 %v67_v8  ;;  %v42_v21 = vld [vmem:[#allocation5 + $0x20] sm:$0xff]  ;;  %v60_v22 = vld [vmem:[#allocation5 + $0xb0] sm:$0xff]  ;;  %v41_v23 = vld [vmem:[#allocation5 + $0x18] sm:$0xff] }
  0x22   :  { %393 = vmatprep.subr.mxu0 %v569_v0  ;;  %428 = vmatprep.subr.mxu1 %v569_v0  ;;  %v59_v24 = vld [vmem:[#allocation5 + $0xa8] sm:$0xff]  ;;  %v40_v25 = vld [vmem:[#allocation5 + $0x10] sm:$0xff]  ;;  %v58_v26 = vld [vmem:[#allocation5 + $0xa0] sm:$0xff]  ;;  %p547_p0 = pnand %p546_p13, %p540_p10 }
  0x23   :  { %394 = vmatpush3.msra.mxu0 %v50_v4  ;;  %429 = vmatpush3.msra.mxu1 %v66_v10  ;;  %v39_v27 = vld [vmem:[#allocation5 + $0x8] sm:$0xff]  ;;  %v38_v28 = vld [vmem:[#allocation5] sm:$0xff]  ;;  %v89_v29 = vld [vmem:[#allocation2] sm:$0xff] }
  0x24   :  { %395 = vmatprep.subr.mxu0 %v569_v0  ;;  %430 = vmatprep.subr.mxu1 %v569_v0  ;;  %v57_v30 = vld [vmem:[#allocation5 + $0x98] sm:$0xff]  ;;  %v56_v31 = vld [vmem:[#allocation5 + $0x90] sm:$0xff]  ;;  %v55_v32 = vld [vmem:[#allocation5 + $0x88] sm:$0xff] }
  0x25   :  { %396 = vmatpush3.msra.mxu0 %v49_v6  ;;  %431 = vmatpush3.msra.mxu1 %v65_v12  ;;  %v54_v33 = vld [vmem:[#allocation5 + $0x80] sm:$0xff]  ;;  %v85_v34 = vld [vmem:[#allocation5 + $0x178] sm:$0xff]  ;;  %v84_v35 = vld [vmem:[#allocation5 + $0x170] sm:$0xff] }
  0x26   :  { %397 = vmatprep.subr.mxu0 %v569_v0  ;;  %432 = vmatprep.subr.mxu1 %v569_v0  ;;  %v83_v36 = vld [vmem:[#allocation5 + $0x168] sm:$0xff]  ;;  %v82_v37 = vld [vmem:[#allocation5 + $0x160] sm:$0xff]  ;;  %v81_v38 = vld [vmem:[#allocation5 + $0x158] sm:$0xff] }
  0x27   :  { %398 = vmatpush3.msra.mxu0 %v48_v9  ;;  %433 = vmatpush3.msra.mxu1 %v64_v14  ;;  %v80_v39 = vld [vmem:[#allocation5 + $0x150] sm:$0xff]  ;;  %v79_v40 = vld [vmem:[#allocation5 + $0x148] sm:$0xff]  ;;  %v78_v41 = vld [vmem:[#allocation5 + $0x140] sm:$0xff] }
  0x28   :  { %399 = vmatprep.subr.mxu0 %v569_v0  ;;  %434 = vmatprep.subr.mxu1 %v569_v0  ;;  %v77_v42 = vld [vmem:[#allocation5 + $0x138] sm:$0xff]  ;;  %v76_v43 = vld [vmem:[#allocation5 + $0x130] sm:$0xff]  ;;  %v75_v44 = vld [vmem:[#allocation5 + $0x128] sm:$0xff] }
  0x29   :  { %400 = vmatpush3.msra.mxu0 %v47_v11  ;;  %435 = vmatpush3.msra.mxu1 %v63_v16  ;;  %v74_v45 = vld [vmem:[#allocation5 + $0x120] sm:$0xff]  ;;  %v73_v52 = vld [vmem:[#allocation5 + $0x118] sm:$0xff]  ;;  %v72_v53 = vld [vmem:[#allocation5 + $0x110] sm:$0xff] }
  0x2a   :  { %401 = vmatprep.subr.mxu0 %v569_v0  ;;  %436 = vmatprep.subr.mxu1 %v569_v0  ;;  %v333_v46 = vld [vmem:[#allocation5 + $0x180] ss:$0 sm:$0xff]  ;;  %v71_v54 = vld [vmem:[#allocation5 + $0x108] sm:$0xff]  ;;  %v335_v62 = vld [vmem:[#allocation5 + $0x190] ss:$0 sm:$0xff] }
  0x2b   :  { %402 = vmatpush3.msra.mxu0 %v46_v13  ;;  %437 = vmatpush3.msra.mxu1 %v62_v18  ;;  %v70_v55 = vld [vmem:[#allocation5 + $0x100] sm:$0xff]  ;;  %v334_v56 = vld [vmem:[#allocation5 + $0x188] ss:$0 sm:$0xff] }
  0x2c   :  { %403 = vmatprep.subr.mxu0 %v569_v0  ;;  %438 = vmatprep.subr.mxu1 %v569_v0 }
  0x2d   :  { %404 = vmatpush3.msra.mxu0 %v45_v15  ;;  %439 = vmatpush3.msra.mxu1 %v61_v20 }
  0x2e   :  { %405 = vmatprep.subr.mxu0 %v569_v0  ;;  %440 = vmatprep.subr.mxu1 %v569_v0 }
  0x2f   :  { %406 = vmatpush3.msra.mxu0 %v44_v17  ;;  %441 = vmatpush3.msra.mxu1 %v60_v22 }
  0x30   :  { %407 = vmatprep.subr.mxu0 %v569_v0  ;;  %442 = vmatprep.subr.mxu1 %v569_v0 }
  0x31   :  { %408 = vmatpush3.msra.mxu0 %v43_v19  ;;  %443 = vmatpush3.msra.mxu1 %v59_v24 }
  0x32   :  { %409 = vmatprep.subr.mxu0 %v569_v0  ;;  %444 = vmatprep.subr.mxu1 %v569_v0 }
  0x33   :  { %410 = vmatpush3.msra.mxu0 %v42_v21  ;;  %445 = vmatpush3.msra.mxu1 %v58_v26 }
  0x34   :  { %411 = vmatprep.subr.mxu0 %v569_v0  ;;  %446 = vmatprep.subr.mxu1 %v569_v0 }
  0x35   :  { %412 = vmatpush3.msra.mxu0 %v41_v23  ;;  %447 = vmatpush3.msra.mxu1 %v57_v30 }
  0x36   :  { %413 = vmatprep.subr.mxu0 %v569_v0  ;;  %448 = vmatprep.subr.mxu1 %v569_v0 }
  0x37   :  { %414 = vmatpush3.msra.mxu0 %v40_v25  ;;  %449 = vmatpush3.msra.mxu1 %v56_v31 }
  0x38   :  { %415 = vmatprep.subr.mxu0 %v569_v0  ;;  %450 = vmatprep.subr.mxu1 %v569_v0 }
  0x39   :  { %416 = vmatpush3.msra.mxu0 %v39_v27  ;;  %451 = vmatpush3.msra.mxu1 %v55_v32 }
  0x3a   :  { %417 = vmatprep.subr.mxu0 %v569_v0  ;;  %452 = vmatprep.subr.mxu1 %v569_v0 }
  0x3b   :  { %418 = vmatpush3.msra.mxu0 %v38_v28  ;;  %453 = vmatpush3.msra.mxu1 %v54_v33 }
  0x3c   :  { %420 = vmatmul.mubr.f32.vlgmr.msra.gmra.mxu0 %v89_v29  ;;  %457 = vmatprep.subr.mxu0 %v569_v0 }
  0x3d   :  { %489 = vmatprep.mubr.msk.f32.mxu0 %vm570_vm0, %v569_v0  ;;  %458 = vmatpush3.msra.mxu0 %v85_v34 }
  0x3e   :  { %459 = vmatprep.subr.mxu0 %v569_v0 }
  0x3f   :  { %460 = vmatpush3.msra.mxu0 %v84_v35 }
  0x40   :  { %461 = vmatprep.subr.mxu0 %v569_v0 }
  0x41   :  { %462 = vmatpush3.msra.mxu0 %v83_v36 }
  0x42   :  { %463 = vmatprep.subr.mxu0 %v569_v0 }
  0x43   :  { %464 = vmatpush3.msra.mxu0 %v82_v37 }
  0x44   :  { %465 = vmatprep.subr.mxu0 %v569_v0 }
  0x45   :  { %466 = vmatpush3.msra.mxu0 %v81_v38 }
  0x46   :  { %467 = vmatprep.subr.mxu0 %v569_v0 }
  0x47   :  { %468 = vmatpush3.msra.mxu0 %v80_v39 }
  0x48   :  { %469 = vmatprep.subr.mxu0 %v569_v0 }
  0x49   :  { %470 = vmatpush3.msra.mxu0 %v79_v40 }
  0x4a   :  { %471 = vmatprep.subr.mxu0 %v569_v0 }
  0x4b   :  { %472 = vmatpush3.msra.mxu0 %v78_v41 }
  0x4c   :  { %473 = vmatprep.subr.mxu0 %v569_v0 }
  0x4d   :  { %474 = vmatpush3.msra.mxu0 %v77_v42 }
  0x4e   :  { %475 = vmatprep.subr.mxu0 %v569_v0 }
  0x4f   :  { %476 = vmatpush3.msra.mxu0 %v76_v43 }
  0x50   :  { %477 = vmatprep.subr.mxu0 %v569_v0 }
  0x51   :  { %478 = vmatpush3.msra.mxu0 %v75_v44 }
  0x52   :  { %479 = vmatprep.subr.mxu0 %v569_v0 }
  0x53   :  { %480 = vmatpush3.msra.mxu0 %v74_v45 }
  0x54   :  { %481 = vmatprep.subr.mxu0 %v569_v0 }
  0x55   :  { %482 = vmatpush3.msra.mxu0 %v73_v52 }
  0x56   :  { %483 = vmatprep.subr.mxu0 %v569_v0 }
  0x57   :  { %484 = vmatpush3.msra.mxu0 %v72_v53 }
  0x58   :  { %485 = vmatprep.subr.mxu0 %v569_v0 }
  0x59   :  { %486 = vmatpush3.msra.mxu0 %v71_v54 }
  0x5a   :  { %487 = vmatprep.subr.mxu0 %v569_v0 }
  0x5b   :  { %488 = vmatpush3.msra.mxu0 %v70_v55 }
  0xfc   :  { %v160_v47 = vpop.f32.mrf.mxu0 }
  0xfd   :  { %v161_v48 = vadd.f32 %v333_v46, %v160_v47 }
  0xfe   :  { %v421_v49 = vpop.f32.mrf.mxu0 }
  0xff   :  { %v164_v50 = vmax.f32 %v161_v48, 0.0 }
 0x101   :  { %v165_v51 = vmin.f32 %v164_v50, 6.0 }
 0x103   :  { %455 = vmatmul.mubr.f32.vlgmr.msra.gmra.mxu1 %v165_v51 }
 0x1c3   :  { %v236_v57 = vpop.f32.mrf.mxu1 }
 0x1c4   :  { %v237_v58 = vadd.f32 %v334_v56, %v236_v57 }
 0x1c5   :  { %v456_v59 = vpop.f32.mrf.mxu1 }
 0x1c6   :  { %v240_v60 = vmax.f32 %v237_v58, 0.0 }
 0x1c8   :  { %v241_v61 = vmin.f32 %v240_v60, 6.0 }
 0x1ca   :  { %490 = vmatmul.mubr.f32.vlgmr.msra.gmra.mxu0 %v241_v61 }
 0x28a   :  { %v312_v63 = vpop.f32.mrf.mxu0 }
 0x28b   :  { %v313_v1 = vadd.f32 %v335_v62, %v312_v63 }
 0x28c   :  { %v491_v2 = vpop.f32.mrf.mxu0 }
 0x28d   :  { %316 = vst [vmem:[#allocation7] sm:$0xff] %v313_v1 }
 0x28e   :  { %550 = shalt.err (!%p547_p0)
}
 0x28f   :  { %326 = dma.vmem_to_hbm [thread:$0]  %s324_s1, 128, %s652_s2, [#allocation4]  }
 0x290   :  { %563 = dma.done.wait [#allocation4], 128  }
 0x291   :  { %564 = vsyncadd [#allocation4], 4294967168 }
 0x292   :  { %330 = vsyncpa [#allocation3], 1 }
 0x293   :  { %331 = vsyncpa [#allocation6], 1 }
 0x294   :  { %332 = vsyncpa [#allocation4], 1 }

</bundles_post_ra>
